<compile_context>
chip_gen: v7x
topology: tpu7x:2x2x1
jax: 0.10.0
libtpu: 0.0.40
codegen_flags: <defaults>
</compile_context>

<pallas_src>
import functools

import jax
import jax.numpy as jnp
from jax.experimental import pallas as pl
from jax.experimental.pallas import tpu as pltpu


def _softplus(x):
    # Numerically stable softplus with a single exp + single log1p per element
    # (one EUP pass each), instead of the two-branch where() form.
    return jnp.maximum(x, 0.0) + jnp.log1p(jnp.exp(-jnp.abs(x)))


def dng_kernel(x_ref, wt_ref, b_ref, o_ref, *, n_tasks):
    x = x_ref[...]            # (tm, n_in)
    wt = wt_ref[...]          # (n_in, n_out)  -- pre-transposed in the wrapper
    b = b_ref[...]            # (1, n_out)

    # Linear layer on the MXU with f32 accumulation; bias add fuses on the VPU.
    y = jnp.dot(x, wt, preferred_element_type=jnp.float32) + b   # (tm, 4T)

    T = n_tasks
    gamma = y[:, :T]
    # One softplus pass over only the nu/alpha/beta columns (3T wide).
    sp = _softplus(y[:, T:])                                      # (tm, 3T)

    # Four static slab stores into the (4, tm, T) output block.
    o_ref[0] = gamma.astype(o_ref.dtype)
    o_ref[1] = sp[:, :T].astype(o_ref.dtype)
    o_ref[2] = (sp[:, T:2 * T] + 1.0).astype(o_ref.dtype)
    o_ref[3] = sp[:, 2 * T:].astype(o_ref.dtype)


def _pick_batch_tile(batch):
    """Pick the batch tile size tm.  The grid is pl.cdiv(batch, tm):
    - small/medium B: one full-extent block (always legal, any B),
    - medium-large B: two ~equal tiles so "parallel" can shard both v7x TCs,
    - large B: fixed 4096-row tiles (ragged last block handled by Pallas)."""
    cap = 4096
    if batch > 2 * cap:
        return cap
    if batch > 1024:
        half = -(-batch // 2)              # ceil(batch / 2)
        return ((half + 7) // 8) * 8       # sublane-aligned -> 2 grid steps
    return batch                           # single full-extent block


def dense_normal_gamma(x, weight, bias, n_tasks):
    """x: (B, n_in) or (n_in,), weight: (4*n_tasks, n_in), bias: (4*n_tasks,).
    Returns (4, B, n_tasks) float32 (or (4, n_tasks) for 1-D input)."""
    squeeze = x.ndim == 1
    if squeeze:
        x = x[None, :]
    B, n_in = x.shape
    n_out = 4 * n_tasks
    assert weight.shape == (n_out, n_in)

    # TODO(synk): if the producer can hand over bf16 x / W, cast here and keep
    # preferred_element_type=f32 to cut HBM traffic ~33% on this mem-bound head.
    x = x.astype(jnp.float32)
    wt = weight.astype(jnp.float32).T          # (n_in, n_out): transpose once
    bias2d = bias.astype(jnp.float32).reshape(1, n_out)

    tm = _pick_batch_tile(B)
    grid = (pl.cdiv(B, tm),)

    cost = pl.CostEstimate(
        flops=2 * B * n_in * n_out + 2 * B * n_out,
        transcendentals=2 * B * 3 * n_tasks,
        bytes_accessed=4 * (B * n_in + n_in * n_out + n_out + 4 * B * n_tasks),
    )

    kernel = functools.partial(dng_kernel, n_tasks=n_tasks)
    out = pl.pallas_call(
        kernel,
        out_shape=jax.ShapeDtypeStruct((4, B, n_tasks), jnp.float32),
        grid=grid,
        in_specs=[
            # x: tiled over batch
            pl.BlockSpec((tm, n_in), lambda i: (i, 0),
                         memory_space=pltpu.MemorySpace.VMEM),
            # W^T: constant block -> stays resident in VMEM across grid steps
            pl.BlockSpec((n_in, n_out), lambda i: (0, 0),
                         memory_space=pltpu.MemorySpace.VMEM),
            # bias: constant (1, n_out) VMEM tile, broadcast in-kernel
            pl.BlockSpec((1, n_out), lambda i: (0, 0),
                         memory_space=pltpu.MemorySpace.VMEM),
        ],
        # Direct (4, B, T) output: no post-kernel reshape/transpose HBM pass.
        out_specs=pl.BlockSpec((4, tm, n_tasks), lambda i: (0, i, 0),
                               memory_space=pltpu.MemorySpace.VMEM),
        compiler_params=pltpu.CompilerParams(
            dimension_semantics=("parallel",)),
        cost_estimate=cost,
    )(x, wt, bias2d)

    if squeeze:
        out = out[:, 0, :]
    return out


def dense_normal_gamma_ref(x, weight, bias, n_tasks):
    """Pure-JAX reference mirroring the PyTorch forward (2-D input)."""
    y = x @ weight.T + bias
    T = n_tasks
    gamma = y[:, 0 * T:1 * T]
    nu = jax.nn.softplus(y[:, 1 * T:2 * T])
    alpha = jax.nn.softplus(y[:, 2 * T:3 * T]) + 1.0
    beta = jax.nn.softplus(y[:, 3 * T:4 * T])
    return jnp.stack([gamma, nu, alpha, beta])


if __name__ == "__main__":
    # Small shapes consistent with the module: n_input=32, n_out_tasks=4, batch=8.
    B, n_in, n_tasks = 8, 32, 4
    n_out = 4 * n_tasks

    key = jax.random.PRNGKey(0)
    kx, kw, kb = jax.random.split(key, 3)

    x = jax.random.normal(kx, (B, n_in), dtype=jnp.float32)
    bound = 1.0 / (n_in ** 0.5)
    weight = jax.random.uniform(kw, (n_out, n_in), jnp.float32, -bound, bound)
    bias = jax.random.uniform(kb, (n_out,), jnp.float32, -bound, bound)

    out = dense_normal_gamma(x, weight, bias, n_tasks)
    out = jax.block_until_ready(out)

    ref = dense_normal_gamma_ref(x, weight, bias, n_tasks)
    assert out.shape == (4, B, n_tasks), out.shape
    assert jnp.allclose(out, ref, atol=1e-5, rtol=1e-5), "mismatch vs reference"

    # Also exercise a non-multiple-of-8 batch (full-extent block path).
    B2 = 20
    x2 = jax.random.normal(kx, (B2, n_in), dtype=jnp.float32)
    out2 = jax.block_until_ready(dense_normal_gamma(x2, weight, bias, n_tasks))
    ref2 = dense_normal_gamma_ref(x2, weight, bias, n_tasks)
    assert out2.shape == (4, B2, n_tasks), out2.shape
    assert jnp.allclose(out2, ref2, atol=1e-5, rtol=1e-5), "mismatch vs reference (B=20)"

    print("KERNEL_OK")
</pallas_src>

<mosaic_0001>
module attributes {stable_mosaic.version = 11 : i64} {
  func.func @dng_kernel(%arg0: i32, %arg1: memref<8x32xf32, #tpu.memory_space<vmem>>, %arg2: memref<32x16xf32, #tpu.memory_space<vmem>>, %arg3: memref<1x16xf32, #tpu.memory_space<vmem>>, %arg4: memref<4x8x4xf32, #tpu.memory_space<vmem>>) attributes {dimension_semantics = [#tpu.dimension_semantics<parallel>], iteration_bounds = array<i64: 1>, scalar_prefetch = 0 : i64, scratch_operands = 0 : i64, tpu.core_type = #tpu.core_type<tc>, window_params = [{transform_indices = @transform_0, window_bounds = array<i64: 8, 32>}, {pipeline_mode = #tpu.pipeline_mode<synchronous>, transform_indices = @transform_1, window_bounds = array<i64: 32, 16>}, {pipeline_mode = #tpu.pipeline_mode<synchronous>, transform_indices = @transform_2, window_bounds = array<i64: 1, 16>}, {transform_indices = @transform_3, window_bounds = array<i64: 4, 8, 4>}]} {
    %c0 = arith.constant 0 : index
    %c0_0 = arith.constant 0 : index
    %0 = vector.load %arg1[%c0, %c0_0] : memref<8x32xf32, #tpu.memory_space<vmem>>, vector<8x32xf32>
    %c0_1 = arith.constant 0 : index
    %c0_2 = arith.constant 0 : index
    %1 = vector.load %arg2[%c0_1, %c0_2] : memref<32x16xf32, #tpu.memory_space<vmem>>, vector<32x16xf32>
    %c0_3 = arith.constant 0 : index
    %c0_4 = arith.constant 0 : index
    %2 = vector.load %arg3[%c0_3, %c0_4] : memref<1x16xf32, #tpu.memory_space<vmem>>, vector<1x16xf32>
    %cst = arith.constant dense<0.000000e+00> : vector<8x16xf32>
    %3 = tpu.matmul %0, %1, %cst {dimension_numbers = #tpu.dot_dimension_numbers<[1], [0], [0], [1], [0, 0, 1, 1], [], []>} : vector<8x32xf32>, vector<32x16xf32>, vector<8x16xf32> -> vector<8x16xf32>
    %4 = vector.broadcast %2 : vector<1x16xf32> to vector<8x16xf32>
    %5 = arith.addf %3, %4 : vector<8x16xf32>
    %6 = vector.extract_strided_slice %5 {offsets = [0, 0], sizes = [8, 4], strides = [1, 1]} : vector<8x16xf32> to vector<8x4xf32>
    %7 = vector.extract_strided_slice %5 {offsets = [0, 4], sizes = [8, 12], strides = [1, 1]} : vector<8x16xf32> to vector<8x12xf32>
    %cst_5 = arith.constant 0.000000e+00 : f32
    %8 = vector.broadcast %cst_5 : f32 to vector<8x12xf32>
    %9 = arith.maximumf %7, %8 : vector<8x12xf32>
    %10 = math.absf %7 : vector<8x12xf32>
    %cst_6 = arith.constant 0.000000e+00 : f32
    %11 = vector.broadcast %cst_6 : f32 to vector<8x12xf32>
    %12 = arith.subf %11, %10 : vector<8x12xf32>
    %13 = math.exp %12 : vector<8x12xf32>
    %14 = math.log1p %13 : vector<8x12xf32>
    %15 = arith.addf %9, %14 : vector<8x12xf32>
    %c0_7 = arith.constant 0 : index
    %c0_8 = arith.constant 0 : index
    %c0_9 = arith.constant 0 : index
    %16 = vector.load %arg4[%c0_7, %c0_8, %c0_9] : memref<4x8x4xf32, #tpu.memory_space<vmem>>, vector<1x8x4xf32>
    %17 = vector.shape_cast %16 : vector<1x8x4xf32> to vector<8x4xf32>
    %18 = vector.shape_cast %6 : vector<8x4xf32> to vector<1x8x4xf32>
    tpu.vector_store %arg4[%c0_7, %c0_8, %c0_9], %18 {strides = array<i32>} : memref<4x8x4xf32, #tpu.memory_space<vmem>>, vector<1x8x4xf32>,
    %19 = vector.extract_strided_slice %15 {offsets = [0, 0], sizes = [8, 4], strides = [1, 1]} : vector<8x12xf32> to vector<8x4xf32>
    %c1 = arith.constant 1 : index
    %c0_10 = arith.constant 0 : index
    %c0_11 = arith.constant 0 : index
    %20 = vector.load %arg4[%c1, %c0_10, %c0_11] : memref<4x8x4xf32, #tpu.memory_space<vmem>>, vector<1x8x4xf32>
    %21 = vector.shape_cast %20 : vector<1x8x4xf32> to vector<8x4xf32>
    %22 = vector.shape_cast %19 : vector<8x4xf32> to vector<1x8x4xf32>
    tpu.vector_store %arg4[%c1, %c0_10, %c0_11], %22 {strides = array<i32>} : memref<4x8x4xf32, #tpu.memory_space<vmem>>, vector<1x8x4xf32>,
    %23 = vector.extract_strided_slice %15 {offsets = [0, 4], sizes = [8, 4], strides = [1, 1]} : vector<8x12xf32> to vector<8x4xf32>
    %cst_12 = arith.constant 1.000000e+00 : f32
    %24 = vector.broadcast %cst_12 : f32 to vector<8x4xf32>
    %25 = arith.addf %23, %24 : vector<8x4xf32>
    %c2 = arith.constant 2 : index
    %c0_13 = arith.constant 0 : index
    %c0_14 = arith.constant 0 : index
    %26 = vector.load %arg4[%c2, %c0_13, %c0_14] : memref<4x8x4xf32, #tpu.memory_space<vmem>>, vector<1x8x4xf32>
    %27 = vector.shape_cast %26 : vector<1x8x4xf32> to vector<8x4xf32>
    %28 = vector.shape_cast %25 : vector<8x4xf32> to vector<1x8x4xf32>
    tpu.vector_store %arg4[%c2, %c0_13, %c0_14], %28 {strides = array<i32>} : memref<4x8x4xf32, #tpu.memory_space<vmem>>, vector<1x8x4xf32>,
    %29 = vector.extract_strided_slice %15 {offsets = [0, 8], sizes = [8, 4], strides = [1, 1]} : vector<8x12xf32> to vector<8x4xf32>
    %c3 = arith.constant 3 : index
    %c0_15 = arith.constant 0 : index
    %c0_16 = arith.constant 0 : index
    %30 = vector.load %arg4[%c3, %c0_15, %c0_16] : memref<4x8x4xf32, #tpu.memory_space<vmem>>, vector<1x8x4xf32>
    %31 = vector.shape_cast %30 : vector<1x8x4xf32> to vector<8x4xf32>
    %32 = vector.shape_cast %29 : vector<8x4xf32> to vector<1x8x4xf32>
    tpu.vector_store %arg4[%c3, %c0_15, %c0_16], %32 {strides = array<i32>} : memref<4x8x4xf32, #tpu.memory_space<vmem>>, vector<1x8x4xf32>,
    return
  }
  func.func @transform_0(%arg0: i32) -> (i32, i32) {
    %c0_i32 = arith.constant 0 : i32
    %c0_i32_0 = arith.constant 0 : i32
    return %arg0, %c0_i32 : i32, i32
  }
  func.func @transform_1(%arg0: i32) -> (i32, i32) {
    %c0_i32 = arith.constant 0 : i32
    %c0_i32_0 = arith.constant 0 : i32
    %c0_i32_1 = arith.constant 0 : i32
    return %c0_i32, %c0_i32_0 : i32, i32
  }
  func.func @transform_2(%arg0: i32) -> (i32, i32) {
    %c0_i32 = arith.constant 0 : i32
    %c0_i32_0 = arith.constant 0 : i32
    %c0_i32_1 = arith.constant 0 : i32
    return %c0_i32, %c0_i32_0 : i32, i32
  }
  func.func @transform_3(%arg0: i32) -> (i32, i32, i32) {
    %c0_i32 = arith.constant 0 : i32
    %c0_i32_0 = arith.constant 0 : i32
    %c0_i32_1 = arith.constant 0 : i32
    return %c0_i32, %arg0, %c0_i32_0 : i32, i32, i32
  }
}

</mosaic_0001>

<bundles_post_ra>
// kernel: tpu_custom_call.1
= control target key start
LH: loop header
LB: loop body
LE: loop exit
PB: predicated region body
PF: predicated region fallthrough
CT: control target
= control target key end

     0   :  { %v176_v0 = vmov 0.0|0.0   ;;  %vm177_vm0 = vmmov 0   ;;  %v178_v4 = vmov 0.0   ;;  %vm26_vm1 = vcmask 261120   ;;  %s181_s25 = smov 120   ;;  %s236_s1 = inlined_call_operand.vmem [shape: f32[32,16], index: 1, kind: input, shape index: {}]   ;;  %s237_s0 = inlined_call_operand.vmem [shape: f32[8,32], index: 0, kind: input, shape index: {}]   ;;  %s238_s2 = inlined_call_operand.vmem [shape: f32[1,16], index: 2, kind: input, shape index: {}]   ;;  %s239_s3 = inlined_call_operand.vmem [shape: f32[4,8,4], index: 3, kind: output, shape index: {}]  }
   0x1   :  { %160 = vmatprep.subr.bf16.mxu0 %v176_v0  ;;  %v15_v1 = vld [vmem:[%s236_s1] sm:$0xff]  ;;  %v16_v2 = vld [vmem:[%s236_s1 + $0x8] sm:$0xff]  ;;  %v17_v3 = vld [vmem:[%s236_s1 + $0x10] sm:$0xff]  ;;  %157 = vmatprep.mubr.msk.f32.mxu0 %vm177_vm0, %v178_v4  ;;  %vm115_vm2 = vcmask 31744  }
   0x2   :  { %v161_v5 = vpack.c.bf16 %v16_v2, %v15_v1  ;;  %v18_v6 = vld [vmem:[%s236_s1 + $0x18] sm:$0xff]  ;;  %v14_v8 = vld [vmem:[%s237_s0] sm:$0xff]  ;;  %s179_s0 = smov 116  }
   0x3   :  { %v164_v7 = vpack.c.bf16 %v18_v6, %v17_v3  ;;  %v139_v9 = vld [vmem:[%s238_s2] ss:$0 sm:$0xff]  ;;  %s180_s2 = smov 124  }
   0x4   :  { %162 = vmatpush3.bf16.msra.mxu0 %v161_v5 }
   0x5   :  { %163 = vmatprep.subr.bf16.mxu0 %v176_v0 }
   0x8   :  { %165 = vmatpush3.bf16.msra.mxu0 %v164_v7 }
   0xb   :  { %158 = vmatmul.mubr.msk.f32.vlgmr.msra.gmra.mrb[0].mxu0 %vm26_vm1, %v14_v8 }
  0xde   :  { %v96_v10 = vpop.f32.mrb[0].mxu0 }
  0xdf   :  { %v97_v11 = vadd.f32 %v139_v9, %v96_v10  ;;  %v159_v12 = vpop.f32.mrb[1].mxu0 }
  0xe1   :  { %v101_v13 = vand.u32 2147483647, %v97_v11  ;;  %116 = vst.msk [vmem:[%s239_s3] sm:$0xff] %vm115_vm2, %v97_v11  ;;  %v100_v24 = vmax.f32 %v97_v11, 0.0 }
  0xe3   :  { %v102_v14 = vsub.f32 0.0, %v101_v13 }
  0xe5   :  { %v103_v15 = vmul.f32 1.442695, %v102_v14 }
  0xe7   :  { %172 = vpow2.f32 %v103_v15 }
  0xf1   :  { %v173_v16 = vpop.eup %172 }
  0xf2   :  { %v105_v17 = vadd.f32 1.0, %v173_v16  ;;  %v108_v18 = vmul.f32 -0.5, %v173_v16  ;;  %v111_v20 = vand.u32 2147483647, %v173_v16 }
  0xf4   :  { %174 = vlog2.f32 %v105_v17  ;;  %v109_v19 = vadd.f32 1.0, %v108_v18  ;;  %vm112_vm3 = vcmp.lt.f32.partialorder %v111_v20, 0.0004427343 }
  0xf6   :  { %v110_v23 = vmul.f32 %v173_v16, %v109_v19 }
  0xfe   :  { %v175_v21 = vpop.eup %174 }
  0xff   :  { %v107_v22 = vmul.f32 0.6931472, %v175_v21 }
 0x101   :  { %v113_v25 = vsel %vm112_vm3, %v110_v23, %v107_v22 }
 0x102   :  { %v114_v26 = vadd.f32 %v113_v25, %v100_v24 }
 0x104   :  { %130 = vrot.lane.b32.xlu1 %v114_v26, %s179_s0  ;;  %118 = vrot.lane.b32.xlu0 %v114_v26, %s180_s2  ;;  %v123_v27 = vadd.f32 1.0, %v114_v26 }
 0x108   :  { %125 = vrot.lane.b32.xlu0 %v123_v27, %s181_s25 }
 0x176   :  { %v131_v28 = vpop.permute.xlu1 %130  ;;  %v119_v29 = vpop.permute.xlu0 %118 }
 0x177   :  { %143 = vst.msk [vmem:[%s239_s3 + $0x18] sm:$0xff] %vm115_vm2, %v131_v28  ;;  %141 = vst.msk [vmem:[%s239_s3 + $0x8] sm:$0xff] %vm115_vm2, %v119_v29 }
 0x17a   :  { %v126_v30 = vpop.permute.xlu0 %125 }
 0x17b   :  { %142 = vst.msk [vmem:[%s239_s3 + $0x10] sm:$0xff] %vm115_vm2, %v126_v30 }

</bundles_post_ra>
